<compile_context>
chip_gen: v6e
topology: v6e:2x2x1
jax: 0.10.0
libtpu: 0.0.40
codegen_flags: <defaults>
</compile_context>

<pallas_src>
import jax
import jax.numpy as jnp
from jax.experimental import pallas as pl
from jax.experimental.pallas import tpu as pltpu

LANE = 512           # lane-dense last dim (multiple of 128) -> unmasked vst's
MAX_ROW_TILE = 1024  # 1024x512 f32 tile = 2 MiB; x+y double-buffered ~= 8 MiB VMEM
_MIN_SUBLANE = {4: 8, 2: 16, 1: 32}  # (sublane,128) tiling minimum per itemsize


def _linreg_kernel(p_ref, x_ref, o_ref):
    # p_ref: (2,) f32 in SMEM = [weights, bias]; x_ref/o_ref: (row_tile, LANE)
    # tiles in VMEM (native dtype). Compute in f32 in-vreg, store native dtype.
    w = p_ref[0]
    b = p_ref[1]
    o_ref[...] = (w * x_ref[...].astype(jnp.float32) + b).astype(o_ref.dtype)


def _pallas_linreg(x2d: jax.Array, params: jax.Array, row_tile: int,
                   donate_x: bool = False) -> jax.Array:
    rows, lane = x2d.shape
    assert rows % row_tile == 0 and lane == LANE
    return pl.pallas_call(
        _linreg_kernel,
        out_shape=jax.ShapeDtypeStruct((rows, lane), x2d.dtype),
        grid_spec=pl.GridSpec(
            grid=(rows // row_tile,),
            in_specs=[
                pl.BlockSpec(memory_space=pltpu.SMEM),             # params (2,)
                pl.BlockSpec((row_tile, lane), lambda i: (i, 0)),  # x tile -> VMEM
            ],
            out_specs=pl.BlockSpec((row_tile, lane), lambda i: (i, 0)),
        ),
        compiler_params=pltpu.CompilerParams(
            # Independent row tiles: shard across both TensorCores on v7x.
            dimension_semantics=("parallel",),
        ),
        # Alias the x slab to the output when the caller can donate x.
        input_output_aliases=({1: 0} if donate_x else {}),
    )(params, x2d)


def _pick_row_tile(rows: int, min_sublane: int) -> int:
    """Largest power-of-two row tile whose padding overshoot stays small."""
    slack = max(min_sublane, rows // 8)
    cand = MAX_ROW_TILE
    while cand > min_sublane:
        if (-rows) % cand < slack:
            return cand
        cand //= 2
    return min_sublane


def linear_regression_forward(x: jax.Array, weights: jax.Array, bias: jax.Array,
                              *, min_pallas_elems: int = 128 * 1024,
                              donate_x: bool = False) -> jax.Array:
    """y = weights * x + bias (elementwise), computed in a Pallas TPU kernel.

    Accepts any input shape/floating dtype; the data is viewed as a lane-dense
    [rows, 512] slab in its native dtype (padding only when the element count
    does not already form an exact slab), streamed through the kernel, and the
    original shape restored.
    """
    orig_shape = x.shape
    if (not jnp.issubdtype(x.dtype, jnp.floating)) or x.dtype.itemsize not in (2, 4):
        x = x.astype(jnp.float32)
    dtype = x.dtype

    # Pack scalars into one SMEM operand (single scalar path).
    params = jnp.stack([weights.reshape(-1)[0], bias.reshape(-1)[0]]).astype(jnp.float32)

    n = int(x.size)
    if n == 0:
        return x.reshape(orig_shape)

    # Tiny inputs: kernel launch + DMA fixed cost dwarfs the work; XLA fuses
    # the scalar axpy for free.
    if n < min_pallas_elems:
        y = params[0] * x.astype(jnp.float32) + params[1]
        return y.astype(dtype).reshape(orig_shape)

    min_sublane = _MIN_SUBLANE[dtype.itemsize]
    rows = max(min_sublane, -(-n // LANE))            # ceil(n / LANE)
    rows = -(-rows // min_sublane) * min_sublane      # sublane-tiling multiple
    row_tile = _pick_row_tile(rows, min_sublane)      # bounded padding overshoot
    rows = -(-rows // row_tile) * row_tile
    # v7x: >= 2 grid steps so the "parallel" axis shards across both TCs.
    while rows // row_tile < 2 and row_tile > min_sublane:
        row_tile //= 2
    n_pad = rows * LANE

    flat = x.reshape(-1)
    if n_pad == n:
        # Fast path: exact slab -> no pad copy, no tail-slice copy.
        y2d = _pallas_linreg(flat.reshape(rows, LANE), params, row_tile, donate_x)
        return y2d.reshape(orig_shape)

    # TODO(synk): fold the ragged tail into the kernel (scalar-prefetched n +
    # masked stores) to eliminate this pad/slice pair entirely.
    flat = jnp.pad(flat, (0, n_pad - n))
    y2d = _pallas_linreg(flat.reshape(rows, LANE), params, row_tile, donate_x)
    return y2d.reshape(-1)[:n].reshape(orig_shape)


if __name__ == "__main__":
    key = jax.random.PRNGKey(0)
    kw, kb, kx1, kx2, kx3, kx4 = jax.random.split(key, 6)

    # Parameters: same shapes as nn.Parameter(torch.randn(1)) in __init__.
    weights = jax.random.normal(kw, (1,), dtype=jnp.float32)
    bias = jax.random.normal(kb, (1,), dtype=jnp.float32)

    cases = [
        jax.random.normal(kx1, (16, 1), dtype=jnp.float32),    # tiny [N,1] (padded path)
        jax.random.normal(kx2, (1000, 1), dtype=jnp.float32),  # [N,1] regression input
        jax.random.normal(kx3, (8, 512), dtype=jnp.float32),   # exact slab: no pad/slice
        jax.random.normal(kx4, (16, 512), dtype=jnp.float32).astype(jnp.bfloat16),  # bf16 native
    ]

    ok = True
    for x in cases:
        # min_pallas_elems=0 forces the Pallas path even for these small demo shapes.
        y = linear_regression_forward(x, weights, bias, min_pallas_elems=0)
        jax.block_until_ready(y)
        y_ref = (weights[0] * x.astype(jnp.float32) + bias[0]).astype(x.dtype)
        ok = ok and (y.shape == x.shape) and (y.dtype == x.dtype)
        ok = ok and bool(jnp.allclose(y.astype(jnp.float32), y_ref.astype(jnp.float32),
                                      atol=1e-6, rtol=1e-6))

    # Default threshold: tiny inputs take the fused-XLA fallback path.
    y_small = linear_regression_forward(cases[0], weights, bias)
    jax.block_until_ready(y_small)
    ok = ok and bool(jnp.allclose(y_small, weights[0] * cases[0] + bias[0],
                                  atol=1e-6, rtol=1e-6))

    assert ok
    print("KERNEL_OK")
</pallas_src>

<mosaic_0001>
module attributes {stable_mosaic.version = 11 : i64} {
  func.func @_linreg_kernel(%arg0: i32, %arg1: memref<2xf32, #tpu.memory_space<smem>>, %arg2: memref<8x512xf32, #tpu.memory_space<vmem>>, %arg3: memref<8x512xf32, #tpu.memory_space<vmem>>) attributes {dimension_semantics = [#tpu.dimension_semantics<parallel>], iteration_bounds = array<i64: 1>, scalar_prefetch = 0 : i64, scratch_operands = 0 : i64, tpu.core_type = #tpu.core_type<tc>, window_params = [{transform_indices = @transform_0, window_bounds = array<i64: 2>}, {transform_indices = @transform_1, window_bounds = array<i64: 8, 512>}, {transform_indices = @transform_2, window_bounds = array<i64: 8, 512>}]} {
    %c0 = arith.constant 0 : index
    %0 = memref.load %arg1[%c0] : memref<2xf32, #tpu.memory_space<smem>>
    %c1 = arith.constant 1 : index
    %1 = memref.load %arg1[%c1] : memref<2xf32, #tpu.memory_space<smem>>
    %c0_0 = arith.constant 0 : index
    %c0_1 = arith.constant 0 : index
    %2 = vector.load %arg2[%c0_0, %c0_1] : memref<8x512xf32, #tpu.memory_space<vmem>>, vector<8x512xf32>
    %3 = vector.broadcast %0 : f32 to vector<8x512xf32>
    %4 = arith.mulf %3, %2 : vector<8x512xf32>
    %5 = vector.broadcast %1 : f32 to vector<8x512xf32>
    %6 = arith.addf %4, %5 : vector<8x512xf32>
    %c0_2 = arith.constant 0 : index
    %c0_3 = arith.constant 0 : index
    %7 = vector.load %arg3[%c0_2, %c0_3] : memref<8x512xf32, #tpu.memory_space<vmem>>, vector<8x512xf32>
    tpu.vector_store %arg3[%c0_2, %c0_3], %6 {strides = array<i32>} : memref<8x512xf32, #tpu.memory_space<vmem>>, vector<8x512xf32>,
    return
  }
  func.func @transform_0(%arg0: i32) -> i32 {
    %c0_i32 = arith.constant 0 : i32
    %c0_i32_0 = arith.constant 0 : i32
    return %c0_i32 : i32
  }
  func.func @transform_1(%arg0: i32) -> (i32, i32) {
    %c0_i32 = arith.constant 0 : i32
    %c0_i32_0 = arith.constant 0 : i32
    return %arg0, %c0_i32 : i32, i32
  }
  func.func @transform_2(%arg0: i32) -> (i32, i32) {
    %c0_i32 = arith.constant 0 : i32
    %c0_i32_0 = arith.constant 0 : i32
    return %arg0, %c0_i32 : i32, i32
  }
}

</mosaic_0001>

<bundles_post_ra>
// kernel: tpu_custom_call.1
= control target key start
LH: loop header
LB: loop body
LE: loop exit
PB: predicated region body
PF: predicated region fallthrough
CT: control target
= control target key end

     0   :  { %7 = vsyncpa [#allocation5], 0  ;;  %s156_s0 = inlined_call_operand.hbm [shape: f32[2], index: 0, kind: input, shape index: {}]   ;;  %s157_s1 = inlined_call_operand.hbm [shape: f32[8,512], index: 1, kind: input, shape index: {}]   ;;  %s158_s2 = inlined_call_operand.hbm [shape: f32[8,512], index: 2, kind: output, shape index: {}]  }
   0x1   :  { %8 = vsyncpa [#allocation3], 0 }
   0x2   :  { %9 = vsyncpa [#allocation4], 0  ;;  %s129_s9 = smov [#allocation2]   ;;  %s130_s12 = smov [#allocation6]  }
   0x3   :  { %17 = dma.hbm_to_smem %s156_s0, 16, %s129_s9, [#allocation5]  }
   0x4   :  { %s24_s13 = sshll.u32 %s130_s12, 4  ;;  %s25_s13 = int_to_ptr.vmem [resolvable:$true] %s24_s13 }
   0x5   :  { %s91_s14 = scalar_lea.vmem %s25_s13, 512  ;;  %p96_p1 = scmp.lt.s32.totalorder %s25_s13, %s25_s13 }
   0x6   :  { %p92_p0 = scmp.ne.s32.totalorder %s25_s13, %s91_s14  ;;  %p97_p2 = scmp.lt.s32.totalorder %s91_s14, %s91_s14 }
   0x8   :  { %p98_p3 = por %p97_p2, %p96_p1 }
   0xa   :  { %p99_p4 = pnand %p98_p3, %p92_p0 }
   0xc   :  { %102 = shalt.err (!%p99_p4)
}
   0xd   :  { %27 = dma.hbm_to_vmem [thread:$0]  %s157_s1, 512, %s25_s13, [#allocation3]  }
   0xe   :  { %123 = dma.done.wait [#allocation5], 16  }
   0xf   :  { %124 = vsyncadd [#allocation5], 4294967280 }
  0x10   :  { %125 = dma.done.wait [#allocation3], 512  }
  0x11   :  { %126 = vsyncadd [#allocation3], 4294966784 }
  0x12   :  { %34 = sfence }
  0x13   :  { %s35_s0 = sld [smem:[#allocation2]]  ;;  %v37_v0 = vld [vmem:[#allocation6] sm:$0xff]  ;;  %v38_v1 = vld [vmem:[#allocation6 + $0x8] sm:$0xff]  ;;  %v39_v2 = vld [vmem:[#allocation6 + $0x10] sm:$0xff]  ;;  %s131_s18 = smov [#allocation7]  }
  0x14   :  { %s71_s17 = sld [smem:[#allocation2 + $0x1]]  ;;  %v40_v3 = vld [vmem:[#allocation6 + $0x18] sm:$0xff]  ;;  %s61_s19 = sshll.u32 %s131_s18, 4  ;;  %s62_s19 = int_to_ptr.vmem [resolvable:$true] %s61_s19 }
  0x15   :  { %s103_s1 = scalar_lea.vmem %s62_s19, 512  ;;  %p108_p6 = scmp.lt.s32.totalorder %s62_s19, %s62_s19 }
  0x16   :  { %p104_p5 = scmp.ne.s32.totalorder %s62_s19, %s103_s1  ;;  %p109_p7 = scmp.lt.s32.totalorder %s103_s1, %s103_s1 }
  0x18   :  { %p110_p8 = por %p109_p7, %p108_p6 }
  0x19   :  { %v41_v4 = vstv %s35_s0 }
  0x1a   :  { %v42_v5 = vmul.f32 %v41_v4, %v37_v0  ;;  %v46_v6 = vstv %s71_s17  ;;  %v43_v7 = vmul.f32 %v41_v4, %v38_v1  ;;  %v44_v8 = vmul.f32 %v41_v4, %v39_v2  ;;  %p111_p9 = pnand %p110_p8, %p104_p5 }
  0x1b   :  { %v45_v9 = vmul.f32 %v41_v4, %v40_v3 }
  0x1c   :  { %v47_v10 = vadd.f32 %v46_v6, %v42_v5  ;;  %v48_v11 = vadd.f32 %v46_v6, %v43_v7  ;;  %v49_v12 = vadd.f32 %v46_v6, %v44_v8 }
  0x1d   :  { %v50_v13 = vadd.f32 %v46_v6, %v45_v9 }
  0x1e   :  { %51 = vst [vmem:[#allocation7] sm:$0xff] %v47_v10  ;;  %52 = vst [vmem:[#allocation7 + $0x8] sm:$0xff] %v48_v11 }
  0x1f   :  { %53 = vst [vmem:[#allocation7 + $0x10] sm:$0xff] %v49_v12  ;;  %54 = vst [vmem:[#allocation7 + $0x18] sm:$0xff] %v50_v13 }
  0x20   :  { %114 = shalt.err (!%p111_p9)
}
  0x21   :  { %64 = dma.vmem_to_hbm [thread:$0]  %s62_s19, 512, %s158_s2, [#allocation4]  }
  0x22   :  { %127 = dma.done.wait [#allocation4], 512  }
  0x23   :  { %128 = vsyncadd [#allocation4], 4294966784 }
  0x24   :  { %68 = vsyncpa [#allocation3], 1 }
  0x25   :  { %69 = vsyncpa [#allocation4], 1 }
  0x26   :  { %70 = vsyncpa [#allocation5], 1 }

</bundles_post_ra>
